<compile_context>
chip_gen: v6e
topology: v6e:2x2x1
jax: 0.10.0
libtpu: 0.0.40
codegen_flags: <defaults>
</compile_context>

<pallas_src>
import jax
import jax.numpy as jnp
from jax.experimental import pallas as pl
from jax.experimental.pallas import tpu as pltpu

_MIB = 1024 * 1024


def _make_mish_kernel(refine):
    """refine=True adds one Newton step + exact large-x passthrough (f32 out);
    bf16/f16 outputs skip both (approx vrcp error is already below their ulp)."""

    def kernel(x_ref, o_ref):
        xf = x_ref[...].astype(jnp.float32)   # upcast in-kernel; HBM stays narrow
        # Single-exp Mish: e = exp(x); n = e*(e+2); tanh(softplus(x)) = n/(n+2).
        # Clamp at 20 before exp so e^2 never overflows (mish(x) == x there).
        xc = jnp.minimum(xf, 20.0)
        e = jnp.exp(xc)                        # only transcendental (EUP)
        n = e * (e + 2.0)
        d = n + 2.0
        r = pl.reciprocal(d, approx=True)      # EUP vrcp, separate issue slot
        if refine:
            r = r * (2.0 - d * r)              # 1 Newton step -> ~f32 accurate
            y = xf * n * r
            y = jnp.where(xf > 20.0, xf, y)    # exact passthrough for huge x
        else:
            y = xf * n * r                     # narrow out: approx already < ulp
        o_ref[...] = y.astype(o_ref.dtype)

    return kernel


def _device_params():
    """(target block bytes, #TensorCores/chip, VMEM-limit cap bytes)."""
    try:
        kind = jax.devices()[0].device_kind.lower()
    except Exception:
        kind = ""
    if "v5" in kind:                     # ~0.82 TB/s HBM, 128 MiB physical VMEM
        return 3 * _MIB, 1, 112 * _MIB
    if "v6" in kind:                     # ~1.3 TB/s HBM, 128 MiB physical VMEM
        return 6 * _MIB, 1, 112 * _MIB
    if "7" in kind:                      # v7x: 2 TCs, 64 MiB VMEM per TC
        return 4 * _MIB, 2, 48 * _MIB
    return 4 * _MIB, 1, 48 * _MIB        # unknown chip: stay conservative


def _round_up(a, m):
    return ((a + m - 1) // m) * m


def _choose_width(n, subl):
    """Widest lane dim (multiple of 128) tiling n; prefer sublane-aligned rows."""
    for w in (1024, 512, 256, 128):
        if n % (subl * w) == 0:
            return w
    for w in (1024, 512, 256, 128):
        if n % w == 0:
            return w
    return None


def _mish_jnp(x):
    xf = x.astype(jnp.float32)
    return (xf * jnp.tanh(jax.nn.softplus(xf))).astype(x.dtype)


def _mish_pallas_2d(x_flat, width, subl):
    n = x_flat.shape[0]
    dtype = x_flat.dtype
    itemsize = jnp.dtype(dtype).itemsize
    rows = n // width
    x2d = x_flat.reshape(rows, width)

    target_bytes, num_tc, vmem_cap = _device_params()
    row_bytes = width * itemsize

    def _vmem_estimate(br):
        # 2x double-buffered in + out blocks at the input dtype, plus headroom
        # for ~5 live f32 intermediates of the elementwise chain, plus margin.
        return 4 * br * row_bytes + 5 * br * width * 4 + 4 * _MIB

    if rows <= subl:
        block_rows = rows                     # block == full array dims (legal)
    else:
        block_rows = min(_round_up(rows, subl),
                         max(subl, (target_bytes // row_bytes) // subl * subl))
        # Never exceed the per-generation VMEM budget (buffers + intermediates).
        while _vmem_estimate(block_rows) > vmem_cap and block_rows > subl:
            block_rows = max(subl, (block_rows // 2) // subl * subl)
        # Multi-TC chips (v7x): ~even split with >= 2 pipelined steps per core.
        if num_tc > 1:
            steps = pl.cdiv(rows, block_rows)
            want = min(max(2 * num_tc, _round_up(steps, num_tc)),
                       pl.cdiv(rows, subl))
            if steps < want:
                block_rows = max(subl, _round_up(pl.cdiv(rows, want), subl))

    vmem_limit = int(min(vmem_cap, max(32 * _MIB, _vmem_estimate(block_rows))))
    grid = (pl.cdiv(rows, block_rows),)
    refine = itemsize >= 4

    out2d = pl.pallas_call(
        _make_mish_kernel(refine),
        out_shape=jax.ShapeDtypeStruct((rows, width), dtype),
        grid_spec=pltpu.PrefetchScalarGridSpec(
            num_scalar_prefetch=0,
            grid=grid,
            in_specs=[pl.BlockSpec((block_rows, width), lambda i: (i, 0))],
            out_specs=pl.BlockSpec((block_rows, width), lambda i: (i, 0)),
        ),
        compiler_params=pltpu.CompilerParams(
            dimension_semantics=("parallel",),
            vmem_limit_bytes=vmem_limit,
        ),
    )(x2d)
    return out2d.reshape(-1)


def mish(x):
    """Mish applied elementwise to an arbitrary-shaped array (e.g. NCHW)."""
    orig_shape = x.shape
    n = x.size
    if n == 0:
        return x
    itemsize = jnp.dtype(x.dtype).itemsize
    subl = max(8, 32 // itemsize)          # 8 f32, 16 bf16/f16, 32 int8/fp8
    x_flat = x.reshape(-1)

    width = _choose_width(n, subl)
    if width is not None:
        out = _mish_pallas_2d(x_flat, width, subl)
    else:
        # Ragged size (n % 128 != 0, rare): kernel on the 128-aligned prefix,
        # plain-jnp tail (< 128 elems) — avoids a full-array pad/copy.
        n_main = (n // 128) * 128
        if n_main == 0:
            out = _mish_jnp(x_flat)        # tiny input: not worth a kernel
        else:
            w_main = _choose_width(n_main, subl)
            head = _mish_pallas_2d(x_flat[:n_main], w_main, subl)
            tail = _mish_jnp(x_flat[n_main:])
            out = jnp.concatenate([head, tail])
    return out.reshape(orig_shape)


if __name__ == "__main__":
    key = jax.random.PRNGKey(0)
    x = jax.random.normal(key, (2, 4, 16, 16), dtype=jnp.float32)  # NCHW

    y = jax.block_until_ready(mish(x))

    # reference check in plain JAX
    ref = x * jnp.tanh(jax.nn.softplus(x))
    assert y.shape == x.shape and y.dtype == x.dtype
    assert jnp.allclose(y, ref, atol=1e-4, rtol=1e-4), "mismatch vs reference"

    print("KERNEL_OK")
</pallas_src>

<mosaic_0001>
module attributes {stable_mosaic.version = 11 : i64} {
  func.func @kernel(%arg0: i32, %arg1: memref<8x256xf32, #tpu.memory_space<vmem>>, %arg2: memref<8x256xf32, #tpu.memory_space<vmem>>) attributes {dimension_semantics = [#tpu.dimension_semantics<parallel>], iteration_bounds = array<i64: 1>, scalar_prefetch = 0 : i64, scratch_operands = 0 : i64, tpu.core_type = #tpu.core_type<tc>, window_params = [{transform_indices = @transform_0, window_bounds = array<i64: 8, 256>}, {transform_indices = @transform_1, window_bounds = array<i64: 8, 256>}]} {
    %c0 = arith.constant 0 : index
    %c0_0 = arith.constant 0 : index
    %0 = vector.load %arg1[%c0, %c0_0] : memref<8x256xf32, #tpu.memory_space<vmem>>, vector<8x256xf32>
    %cst = arith.constant 2.000000e+01 : f32
    %1 = vector.broadcast %cst : f32 to vector<8x256xf32>
    %2 = arith.minimumf %0, %1 : vector<8x256xf32>
    %3 = math.exp %2 : vector<8x256xf32>
    %cst_1 = arith.constant 2.000000e+00 : f32
    %4 = vector.broadcast %cst_1 : f32 to vector<8x256xf32>
    %5 = arith.addf %3, %4 : vector<8x256xf32>
    %6 = arith.mulf %3, %5 : vector<8x256xf32>
    %cst_2 = arith.constant 2.000000e+00 : f32
    %7 = vector.broadcast %cst_2 : f32 to vector<8x256xf32>
    %8 = arith.addf %6, %7 : vector<8x256xf32>
    %9 = tpu.reciprocal %8 {approx = true} : vector<8x256xf32> -> vector<8x256xf32>
    %10 = arith.mulf %8, %9 : vector<8x256xf32>
    %cst_3 = arith.constant 2.000000e+00 : f32
    %11 = vector.broadcast %cst_3 : f32 to vector<8x256xf32>
    %12 = arith.subf %11, %10 : vector<8x256xf32>
    %13 = arith.mulf %9, %12 : vector<8x256xf32>
    %14 = arith.mulf %0, %6 : vector<8x256xf32>
    %15 = arith.mulf %14, %13 : vector<8x256xf32>
    %cst_4 = arith.constant 2.000000e+01 : f32
    %16 = vector.broadcast %cst_4 : f32 to vector<8x256xf32>
    %17 = arith.cmpf ogt, %0, %16 : vector<8x256xf32>
    %18 = arith.select %17, %0, %15 : vector<8x256xi1>, vector<8x256xf32>
    %c0_5 = arith.constant 0 : index
    %c0_6 = arith.constant 0 : index
    %19 = vector.load %arg2[%c0_5, %c0_6] : memref<8x256xf32, #tpu.memory_space<vmem>>, vector<8x256xf32>
    tpu.vector_store %arg2[%c0_5, %c0_6], %18 {strides = array<i32>} : memref<8x256xf32, #tpu.memory_space<vmem>>, vector<8x256xf32>,
    return
  }
  func.func @transform_0(%arg0: i32) -> (i32, i32) {
    %c0_i32 = arith.constant 0 : i32
    %c0_i32_0 = arith.constant 0 : i32
    return %arg0, %c0_i32 : i32, i32
  }
  func.func @transform_1(%arg0: i32) -> (i32, i32) {
    %c0_i32 = arith.constant 0 : i32
    %c0_i32_0 = arith.constant 0 : i32
    return %arg0, %c0_i32 : i32, i32
  }
}

</mosaic_0001>

<bundles_post_ra>
// kernel: tpu_custom_call.1
= control target key start
LH: loop header
LB: loop body
LE: loop exit
PB: predicated region body
PF: predicated region fallthrough
CT: control target
= control target key end

     0   :  { %6 = vsyncpa [#allocation3], 0  ;;  %s140_s0 = inlined_call_operand.hbm [shape: f32[8,256], index: 0, kind: input, shape index: {}]   ;;  %s141_s1 = inlined_call_operand.hbm [shape: f32[8,256], index: 1, kind: output, shape index: {}]  }
   0x1   :  { %7 = vsyncpa [#allocation4], 0  ;;  %s122_s6 = smov [#allocation2]  }
   0x2   :  { %s14_s7 = sshll.u32 %s122_s6, 4  ;;  %s15_s7 = int_to_ptr.vmem [resolvable:$true] %s14_s7 }
   0x3   :  { %s86_s8 = scalar_lea.vmem %s15_s7, 256  ;;  %p91_p1 = scmp.lt.s32.totalorder %s15_s7, %s15_s7 }
   0x4   :  { %p87_p0 = scmp.ne.s32.totalorder %s15_s7, %s86_s8  ;;  %p92_p2 = scmp.lt.s32.totalorder %s86_s8, %s86_s8 }
   0x6   :  { %p93_p3 = por %p92_p2, %p91_p1 }
   0x8   :  { %p94_p4 = pnand %p93_p3, %p87_p0 }
   0xa   :  { %97 = shalt.err (!%p94_p4)
}
   0xb   :  { %17 = dma.hbm_to_vmem [thread:$0]  %s140_s0, 256, %s15_s7, [#allocation3]  }
   0xc   :  { %118 = dma.done.wait [#allocation3], 256  }
   0xd   :  { %119 = vsyncadd [#allocation3], 4294967040  ;;  %v21_v0 = vld [vmem:[#allocation2] sm:$0xff]  ;;  %v22_v1 = vld [vmem:[#allocation2 + $0x8] sm:$0xff]  ;;  %s123_s0 = smov [#allocation5]  }
   0xe   :  { %v23_v2 = vmin.f32 %v21_v0, 20.0  ;;  %v24_v3 = vmin.f32 %v22_v1, 20.0  ;;  %vm47_vm0 = vcmp.gt.f32.partialorder %v21_v0, 20.0  ;;  %s59_s11 = sshll.u32 %s123_s0, 4  ;;  %vm48_vm1 = vcmp.gt.f32.partialorder %v22_v1, 20.0  ;;  %s60_s11 = int_to_ptr.vmem [resolvable:$true] %s59_s11 }
   0xf   :  { %s98_s12 = scalar_lea.vmem %s60_s11, 256  ;;  %p103_p6 = scmp.lt.s32.totalorder %s60_s11, %s60_s11 }
  0x10   :  { %v25_v4 = vmul.f32 1.442695, %v23_v2  ;;  %v27_v5 = vmul.f32 1.442695, %v24_v3  ;;  %p99_p5 = scmp.ne.s32.totalorder %s60_s11, %s98_s12  ;;  %p104_p7 = scmp.lt.s32.totalorder %s98_s12, %s98_s12 }
  0x12   :  { %70 = vpow2.f32 %v25_v4  ;;  %p105_p8 = por %p104_p7, %p103_p6 }
  0x13   :  { %72 = vpow2.f32 %v27_v5 }
  0x14   :  { %p106_p9 = pnand %p105_p8, %p99_p5 }
  0x1f   :  { %v71_v6 = vpop.eup %70 }
  0x20   :  { %v73_v7 = vpop.eup %72  ;;  %v29_v8 = vadd.f32 2.0, %v71_v6 }
  0x21   :  { %v30_v9 = vadd.f32 2.0, %v73_v7 }
  0x22   :  { %v31_v10 = vmul.f32 %v71_v6, %v29_v8 }
  0x23   :  { %v32_v11 = vmul.f32 %v73_v7, %v30_v9 }
  0x24   :  { %v33_v12 = vadd.f32 2.0, %v31_v10  ;;  %v43_v19 = vmul.f32 %v31_v10, %v21_v0 }
  0x25   :  { %v34_v13 = vadd.f32 2.0, %v32_v11  ;;  %v44_v21 = vmul.f32 %v32_v11, %v22_v1 }
  0x26   :  { %74 = vrcp.f32 %v33_v12 }
  0x27   :  { %76 = vrcp.f32 %v34_v13 }
  0x33   :  { %v75_v14 = vpop.eup %74 }
  0x34   :  { %v77_v15 = vpop.eup %76  ;;  %v37_v16 = vmul.f32 %v75_v14, %v33_v12 }
  0x35   :  { %v38_v17 = vmul.f32 %v77_v15, %v34_v13 }
  0x36   :  { %v39_v18 = vsub.f32 2.0, %v37_v16 }
  0x37   :  { %v40_v20 = vsub.f32 2.0, %v38_v17 }
  0x38   :  { %v41_v22 = vmul.f32 %v75_v14, %v39_v18 }
  0x39   :  { %v42_v23 = vmul.f32 %v77_v15, %v40_v20 }
  0x3a   :  { %v45_v24 = vmul.f32 %v43_v19, %v41_v22 }
  0x3b   :  { %v46_v25 = vmul.f32 %v44_v21, %v42_v23 }
  0x3c   :  { %v49_v26 = vsel %vm47_vm0, %v21_v0, %v45_v24 }
  0x3d   :  { %51 = vst [vmem:[#allocation5] sm:$0xff] %v49_v26  ;;  %v50_v27 = vsel %vm48_vm1, %v22_v1, %v46_v25 }
  0x3e   :  { %52 = vst [vmem:[#allocation5 + $0x8] sm:$0xff] %v50_v27 }
  0x3f   :  { %109 = shalt.err (!%p106_p9)
}
  0x40   :  { %62 = dma.vmem_to_hbm [thread:$0]  %s60_s11, 256, %s141_s1, [#allocation4]  }
  0x41   :  { %120 = dma.done.wait [#allocation4], 256  }
  0x42   :  { %121 = vsyncadd [#allocation4], 4294967040 }
  0x43   :  { %66 = vsyncpa [#allocation3], 1 }
  0x44   :  { %67 = vsyncpa [#allocation4], 1 }

</bundles_post_ra>
